<compile_context>
chip_gen: v7x
topology: tpu7x:2x2x1
jax: 0.10.0
libtpu: 0.0.40
codegen_flags: <defaults>
</compile_context>

<pallas_src>
import functools

import jax
import jax.numpy as jnp
import numpy as np
from jax.experimental import pallas as pl
from jax.experimental.pallas import tpu as pltpu


def _round_up(x, m):
    return ((x + m - 1) // m) * m


def _default_core_splits():
    """2-way parallel split only where there are two TensorCores (v7x)."""
    try:
        kind = jax.devices()[0].device_kind.lower()
        if "v7" in kind:
            return 2
    except Exception:  # pragma: no cover - defensive
        pass
    return 1


def _relation_pred_loss_kernel(logits_ref, labels_ref, weight_ref, out_ref,
                               acc_ref, *, gamma, n_valid_rows):
    # logits_ref: [R, S, 128] (input dtype), labels_ref: [S, 128] i32,
    # weight_ref: [S, 128] f32, acc_ref: [S, 128] f32, out_ref: [1, 1, 1] f32
    step = pl.program_id(1)
    num_steps = pl.num_programs(1)

    @pl.when(step == 0)
    def _():
        acc_ref[...] = jnp.zeros_like(acc_ref)

    logits = logits_ref[...].astype(jnp.float32)   # cast on-chip, DMA in input dtype
    labels = labels_ref[...]                       # [S, 128] int32
    w = weight_ref[...]                            # [S, 128] float32

    R, S, L = logits.shape

    # ---- log-softmax gather of the true class, unrolled over small R ----
    m = logits[0]
    for r in range(1, R):
        m = jnp.maximum(m, logits[r])

    se = jnp.zeros_like(m)
    e_true = jnp.zeros_like(m)
    logit_true = jnp.zeros_like(m)
    for r in range(R):
        row = logits[r]
        e = jnp.exp(row - m)                       # reused for denom and numerator
        se = se + e
        sel = labels == r
        e_true = jnp.where(sel, e, e_true)
        logit_true = jnp.where(sel, row, logit_true)

    log_pt = logit_true - (m + jnp.log(se))        # stable log(p_true)
    pt = e_true * pl.reciprocal(se, approx=True)   # p_true without a second exp

    # ---- focal modulator: (1 - pt)^gamma (integer gamma -> plain VPU mults) ----
    one_minus_pt = 1.0 - pt
    if isinstance(gamma, int):
        mod = jax.lax.integer_pow(one_minus_pt, gamma)
    else:
        mod = one_minus_pt ** jnp.float32(gamma)
    focal = -mod * log_pt                          # [S, 128]

    # ---- mask rows beyond the real pair-row count (partial / clamped blocks) ----
    blk = pl.program_id(0) * num_steps + step
    row_ids = blk * S + jax.lax.broadcasted_iota(jnp.int32, (S, L), 0)
    contrib = jnp.where(row_ids < n_valid_rows, focal * w, 0.0)

    acc_ref[...] += contrib

    @pl.when(step == num_steps - 1)
    def _():
        out_ref[...] = jnp.sum(acc_ref[...]).reshape(1, 1, 1)


def relation_pred_loss(y_rel_pred, y_rel, batch, num_relations, gamma=2,
                       p_tile=131072, num_core_splits=None):
    """Pallas implementation of RelationPredLoss.forward.

    y_rel_pred: [N, N, R] float logits (f32 or bf16; computed in f32 on-chip)
    y_rel:      [N, N]    int labels
    batch:      [N]       int graph id per node
    """
    N = batch.shape[0]
    P = N * N
    R = num_relations
    LANE = 128

    batch = batch.astype(jnp.int32)

    # ---- fold per-graph masked means into per-pair weights (fully traced) ----
    same = batch[:, None] == batch[None, :]                      # [N, N]
    cnt = jnp.sum(same.astype(jnp.float32), axis=1)              # [N] = n_{g(a)}
    num_graphs = (jnp.max(batch) + 1).astype(jnp.float32)        # torch.max(batch)+1
    # NOTE: a gap in graph ids contributes 0 here instead of NaN (empty mean)
    # as the literal PyTorch loop would.
    w_pair = jnp.where(same,
                       1.0 / (cnt[:, None] * cnt[None, :] * num_graphs),
                       0.0)                                      # [N, N]

    # ---- lane-dense layout: relation axis leading, pair axis folded to (rows, 128) ----
    logits = jnp.transpose(y_rel_pred.reshape(P, R))             # [R, P], input dtype
    labels = y_rel.reshape(P).astype(jnp.int32)                  # [P]
    weight = w_pair.reshape(P).astype(jnp.float32)               # [P]

    P128 = _round_up(P, LANE)
    pad = P128 - P
    if pad:
        # Minimal pad (<128 pairs) so the pair axis folds into whole lanes.
        # Padded lanes get weight 0 / logits 0 and contribute exactly 0.
        logits = jnp.pad(logits, ((0, 0), (0, pad)))
        labels = jnp.pad(labels, ((0, pad),))
        weight = jnp.pad(weight, ((0, pad),))
    n_rows = P128 // LANE

    logits = logits.reshape(R, n_rows, LANE)
    labels = labels.reshape(n_rows, LANE)
    weight = weight.reshape(n_rows, LANE)

    # ---- tile sizing: big row tiles (amortize per-step overhead), VMEM-capped ----
    itemsize = jnp.dtype(logits.dtype).itemsize
    sub = 8 if itemsize >= 4 else 16                 # sublane multiple (f32 / bf16)
    rows_cap = max(sub, (4 << 20) // (LANE * R * itemsize))   # <= ~4 MiB logits/buffer
    rows_per_tile = max(1, min(p_tile // LANE, rows_cap))
    if rows_per_tile >= n_rows or n_rows < sub:
        S = n_rows                                   # single block == full row extent
    else:
        S = max(sub, (min(rows_per_tile, n_rows) // sub) * sub)
    total_blocks = (n_rows + S - 1) // S

    if num_core_splits is None:
        num_core_splits = _default_core_splits()
    splits = max(1, min(num_core_splits, total_blocks))
    steps = (total_blocks + splits - 1) // splits
    last_blk = total_blocks - 1

    def blk_idx(s, i):
        # Clamp over-provisioned (splits*steps > total_blocks) block ids onto the
        # last valid block; those iterations are fully masked out in the kernel.
        return jnp.minimum(s * steps + i, last_blk)

    kernel = functools.partial(_relation_pred_loss_kernel, gamma=gamma,
                               n_valid_rows=n_rows)

    partials = pl.pallas_call(
        kernel,
        out_shape=jax.ShapeDtypeStruct((splits, 1, 1), jnp.float32),
        grid_spec=pltpu.PrefetchScalarGridSpec(
            num_scalar_prefetch=0,
            grid=(splits, steps),
            in_specs=[
                pl.BlockSpec((R, S, LANE), lambda s, i: (0, blk_idx(s, i), 0)),
                pl.BlockSpec((S, LANE), lambda s, i: (blk_idx(s, i), 0)),
                pl.BlockSpec((S, LANE), lambda s, i: (blk_idx(s, i), 0)),
            ],
            out_specs=pl.BlockSpec((1, 1, 1), lambda s, i: (s, 0, 0)),
            scratch_shapes=[pltpu.VMEM((S, LANE), jnp.float32)],
        ),
        compiler_params=pltpu.CompilerParams(
            dimension_semantics=("parallel", "arbitrary")),
    )(logits, labels, weight)

    return jnp.sum(partials)


def _reference_loss(y_rel_pred, y_rel, batch, num_relations, gamma=2):
    """Pure-numpy reference mirroring the PyTorch loop literally."""
    logits = np.asarray(jax.device_get(y_rel_pred), dtype=np.float64)
    labels = np.asarray(jax.device_get(y_rel))
    b = np.asarray(jax.device_get(batch))
    B = int(b.max()) + 1
    total = 0.0
    for i in range(B):
        idx = np.nonzero(b == i)[0]
        lg = logits[np.ix_(idx, idx)].reshape(-1, num_relations)
        lb = labels[np.ix_(idx, idx)].reshape(-1)
        lg = lg - lg.max(axis=-1, keepdims=True)
        e = np.exp(lg)
        p = e / e.sum(axis=-1, keepdims=True)
        pt = p[np.arange(lb.shape[0]), lb]
        focal = -((1.0 - pt) ** gamma) * np.log(pt)
        total += focal.mean()
    return total / B


if __name__ == "__main__":
    key = jax.random.PRNGKey(0)
    k1, k2 = jax.random.split(key)

    # ---- small smoke test (single block) ----
    N, R, gamma = 8, 4, 2
    y_rel_pred = jax.random.normal(k1, (N, N, R), dtype=jnp.float32)
    y_rel = jax.random.randint(k2, (N, N), 0, R, dtype=jnp.int32)
    batch = jnp.array([0, 0, 0, 1, 1, 1, 1, 1], dtype=jnp.int32)  # 2 graphs

    loss = jax.block_until_ready(
        relation_pred_loss(y_rel_pred, y_rel, batch, R, gamma))
    ref = _reference_loss(y_rel_pred, y_rel, batch, R, gamma)
    if not np.allclose(np.asarray(loss), ref, rtol=5e-3, atol=1e-4):
        raise AssertionError(f"mismatch (small): pallas={loss} ref={ref}")

    # ---- multi-tile test: exercises partial-block masking and 2-way split ----
    k3, k4 = jax.random.split(k1)
    N2, R2 = 40, 5
    y_rel_pred2 = jax.random.normal(k3, (N2, N2, R2), dtype=jnp.float32)
    y_rel2 = jax.random.randint(k4, (N2, N2), 0, R2, dtype=jnp.int32)
    batch2 = jnp.concatenate([jnp.full((13,), 0, jnp.int32),
                              jnp.full((13,), 1, jnp.int32),
                              jnp.full((14,), 2, jnp.int32)])
    loss2 = jax.block_until_ready(
        relation_pred_loss(y_rel_pred2, y_rel2, batch2, R2, gamma,
                           p_tile=1024, num_core_splits=2))
    ref2 = _reference_loss(y_rel_pred2, y_rel2, batch2, R2, gamma)
    if not np.allclose(np.asarray(loss2), ref2, rtol=5e-3, atol=1e-4):
        raise AssertionError(f"mismatch (tiled): pallas={loss2} ref={ref2}")

    print("KERNEL_OK")
</pallas_src>

<mosaic_0001>
module attributes {stable_mosaic.version = 11 : i64} {
  func.func @_relation_pred_loss_kernel(%arg0: i32, %arg1: i32, %arg2: memref<4x1x128xf32, #tpu.memory_space<vmem>>, %arg3: memref<1x128xi32, #tpu.memory_space<vmem>>, %arg4: memref<1x128xf32, #tpu.memory_space<vmem>>, %arg5: memref<1x1x1xf32, #tpu.memory_space<vmem>>, %arg6: memref<1x128xf32, #tpu.memory_space<vmem>>) attributes {dimension_semantics = [#tpu.dimension_semantics<parallel>, #tpu.dimension_semantics<arbitrary>], iteration_bounds = array<i64: 1, 1>, scalar_prefetch = 0 : i64, scratch_operands = 1 : i64, tpu.core_type = #tpu.core_type<tc>, window_params = [{transform_indices = @transform_0, window_bounds = array<i64: 4, 1, 128>}, {transform_indices = @transform_1, window_bounds = array<i64: 1, 128>}, {transform_indices = @transform_2, window_bounds = array<i64: 1, 128>}, {transform_indices = @transform_3, window_bounds = array<i64: 1, 1, 1>}]} {
    %c0_i32 = arith.constant 0 : i32
    %0 = arith.cmpi eq, %arg1, %c0_i32 : i32
    %1 = arith.extui %0 : i1 to i32
    %c0_i32_0 = arith.constant 0 : i32
    %2 = arith.cmpi ne, %1, %c0_i32_0 : i32
    scf.if %2 {
      %cst_22 = arith.constant 0.000000e+00 : f32
      %84 = vector.broadcast %cst_22 : f32 to vector<1x128xf32>
      %c0_23 = arith.constant 0 : index
      %c0_24 = arith.constant 0 : index
      %85 = vector.load %arg6[%c0_23, %c0_24] : memref<1x128xf32, #tpu.memory_space<vmem>>, vector<1x128xf32>
      tpu.vector_store %arg6[%c0_23, %c0_24], %84 {strides = array<i32>} : memref<1x128xf32, #tpu.memory_space<vmem>>, vector<1x128xf32>,
    } else {
    }
    %c0 = arith.constant 0 : index
    %c0_1 = arith.constant 0 : index
    %c0_2 = arith.constant 0 : index
    %3 = vector.load %arg2[%c0, %c0_1, %c0_2] : memref<4x1x128xf32, #tpu.memory_space<vmem>>, vector<4x1x128xf32>
    %c0_3 = arith.constant 0 : index
    %c0_4 = arith.constant 0 : index
    %4 = vector.load %arg3[%c0_3, %c0_4] : memref<1x128xi32, #tpu.memory_space<vmem>>, vector<1x128xi32>
    %c0_5 = arith.constant 0 : index
    %c0_6 = arith.constant 0 : index
    %5 = vector.load %arg4[%c0_5, %c0_6] : memref<1x128xf32, #tpu.memory_space<vmem>>, vector<1x128xf32>
    %6 = vector.extract_strided_slice %3 {offsets = [0, 0, 0], sizes = [1, 1, 128], strides = [1, 1, 1]} : vector<4x1x128xf32> to vector<1x1x128xf32>
    %7 = vector.shape_cast %6 : vector<1x1x128xf32> to vector<1x128xf32>
    %8 = vector.extract_strided_slice %3 {offsets = [1, 0, 0], sizes = [1, 1, 128], strides = [1, 1, 1]} : vector<4x1x128xf32> to vector<1x1x128xf32>
    %9 = vector.shape_cast %8 : vector<1x1x128xf32> to vector<1x128xf32>
    %10 = arith.maximumf %7, %9 : vector<1x128xf32>
    %11 = vector.extract_strided_slice %3 {offsets = [2, 0, 0], sizes = [1, 1, 128], strides = [1, 1, 1]} : vector<4x1x128xf32> to vector<1x1x128xf32>
    %12 = vector.shape_cast %11 : vector<1x1x128xf32> to vector<1x128xf32>
    %13 = arith.maximumf %10, %12 : vector<1x128xf32>
    %14 = vector.extract_strided_slice %3 {offsets = [3, 0, 0], sizes = [1, 1, 128], strides = [1, 1, 1]} : vector<4x1x128xf32> to vector<1x1x128xf32>
    %15 = vector.shape_cast %14 : vector<1x1x128xf32> to vector<1x128xf32>
    %16 = arith.maximumf %13, %15 : vector<1x128xf32>
    %cst = arith.constant 0.000000e+00 : f32
    %17 = vector.broadcast %cst : f32 to vector<1x128xf32>
    %cst_7 = arith.constant 0.000000e+00 : f32
    %18 = vector.broadcast %cst_7 : f32 to vector<1x128xf32>
    %cst_8 = arith.constant 0.000000e+00 : f32
    %19 = vector.broadcast %cst_8 : f32 to vector<1x128xf32>
    %20 = vector.extract_strided_slice %3 {offsets = [0, 0, 0], sizes = [1, 1, 128], strides = [1, 1, 1]} : vector<4x1x128xf32> to vector<1x1x128xf32>
    %21 = vector.shape_cast %20 : vector<1x1x128xf32> to vector<1x128xf32>
    %22 = arith.subf %21, %16 : vector<1x128xf32>
    %23 = math.exp %22 : vector<1x128xf32>
    %24 = arith.addf %17, %23 : vector<1x128xf32>
    %c0_i32_9 = arith.constant 0 : i32
    %25 = vector.broadcast %c0_i32_9 : i32 to vector<1x128xi32>
    %26 = arith.cmpi eq, %4, %25 : vector<1x128xi32>
    %27 = arith.select %26, %23, %18 : vector<1x128xi1>, vector<1x128xf32>
    %28 = arith.select %26, %21, %19 : vector<1x128xi1>, vector<1x128xf32>
    %29 = vector.extract_strided_slice %3 {offsets = [1, 0, 0], sizes = [1, 1, 128], strides = [1, 1, 1]} : vector<4x1x128xf32> to vector<1x1x128xf32>
    %30 = vector.shape_cast %29 : vector<1x1x128xf32> to vector<1x128xf32>
    %31 = arith.subf %30, %16 : vector<1x128xf32>
    %32 = math.exp %31 : vector<1x128xf32>
    %33 = arith.addf %24, %32 : vector<1x128xf32>
    %c1_i32 = arith.constant 1 : i32
    %34 = vector.broadcast %c1_i32 : i32 to vector<1x128xi32>
    %35 = arith.cmpi eq, %4, %34 : vector<1x128xi32>
    %36 = arith.select %35, %32, %27 : vector<1x128xi1>, vector<1x128xf32>
    %37 = arith.select %35, %30, %28 : vector<1x128xi1>, vector<1x128xf32>
    %38 = vector.extract_strided_slice %3 {offsets = [2, 0, 0], sizes = [1, 1, 128], strides = [1, 1, 1]} : vector<4x1x128xf32> to vector<1x1x128xf32>
    %39 = vector.shape_cast %38 : vector<1x1x128xf32> to vector<1x128xf32>
    %40 = arith.subf %39, %16 : vector<1x128xf32>
    %41 = math.exp %40 : vector<1x128xf32>
    %42 = arith.addf %33, %41 : vector<1x128xf32>
    %c2_i32 = arith.constant 2 : i32
    %43 = vector.broadcast %c2_i32 : i32 to vector<1x128xi32>
    %44 = arith.cmpi eq, %4, %43 : vector<1x128xi32>
    %45 = arith.select %44, %41, %36 : vector<1x128xi1>, vector<1x128xf32>
    %46 = arith.select %44, %39, %37 : vector<1x128xi1>, vector<1x128xf32>
    %47 = vector.extract_strided_slice %3 {offsets = [3, 0, 0], sizes = [1, 1, 128], strides = [1, 1, 1]} : vector<4x1x128xf32> to vector<1x1x128xf32>
    %48 = vector.shape_cast %47 : vector<1x1x128xf32> to vector<1x128xf32>
    %49 = arith.subf %48, %16 : vector<1x128xf32>
    %50 = math.exp %49 : vector<1x128xf32>
    %51 = arith.addf %42, %50 : vector<1x128xf32>
    %c3_i32 = arith.constant 3 : i32
    %52 = vector.broadcast %c3_i32 : i32 to vector<1x128xi32>
    %53 = arith.cmpi eq, %4, %52 : vector<1x128xi32>
    %54 = arith.select %53, %50, %45 : vector<1x128xi1>, vector<1x128xf32>
    %55 = arith.select %53, %48, %46 : vector<1x128xi1>, vector<1x128xf32>
    %56 = math.log %51 : vector<1x128xf32>
    %57 = arith.addf %16, %56 : vector<1x128xf32>
    %58 = arith.subf %55, %57 : vector<1x128xf32>
    %59 = tpu.reciprocal %51 {approx = true} : vector<1x128xf32> -> vector<1x128xf32>
    %60 = arith.mulf %54, %59 : vector<1x128xf32>
    %cst_10 = arith.constant 1.000000e+00 : f32
    %61 = vector.broadcast %cst_10 : f32 to vector<1x128xf32>
    %62 = arith.subf %61, %60 : vector<1x128xf32>
    %63 = arith.mulf %62, %62 : vector<1x128xf32>
    %cst_11 = arith.constant 0.000000e+00 : f32
    %64 = vector.broadcast %cst_11 : f32 to vector<1x128xf32>
    %65 = arith.subf %64, %63 : vector<1x128xf32>
    %66 = arith.mulf %65, %58 : vector<1x128xf32>
    %c1_i32_12 = arith.constant 1 : i32
    %67 = arith.muli %arg0, %c1_i32_12 : i32
    %68 = arith.addi %67, %arg1 : i32
    %c1_i32_13 = arith.constant 1 : i32
    %69 = arith.muli %68, %c1_i32_13 : i32
    %70 = tpu.iota {dimensions = array<i32: 0>} : vector<1x128xi32>
    %71 = vector.broadcast %69 : i32 to vector<1x128xi32>
    %72 = arith.addi %71, %70 : vector<1x128xi32>
    %c1_i32_14 = arith.constant 1 : i32
    %73 = vector.broadcast %c1_i32_14 : i32 to vector<1x128xi32>
    %74 = arith.cmpi slt, %72, %73 : vector<1x128xi32>
    %75 = arith.mulf %66, %5 : vector<1x128xf32>
    %cst_15 = arith.constant 0.000000e+00 : f32
    %76 = vector.broadcast %cst_15 : f32 to vector<1x128xf32>
    %77 = arith.select %74, %75, %76 : vector<1x128xi1>, vector<1x128xf32>
    %c0_16 = arith.constant 0 : index
    %c0_17 = arith.constant 0 : index
    %78 = vector.load %arg6[%c0_16, %c0_17] : memref<1x128xf32, #tpu.memory_space<vmem>>, vector<1x128xf32>
    %79 = arith.addf %78, %77 : vector<1x128xf32>
    %c0_18 = arith.constant 0 : index
    %c0_19 = arith.constant 0 : index
    %80 = vector.load %arg6[%c0_18, %c0_19] : memref<1x128xf32, #tpu.memory_space<vmem>>, vector<1x128xf32>
    tpu.vector_store %arg6[%c0_18, %c0_19], %79 {strides = array<i32>} : memref<1x128xf32, #tpu.memory_space<vmem>>, vector<1x128xf32>,
    %c0_i32_20 = arith.constant 0 : i32
    %81 = arith.cmpi eq, %arg1, %c0_i32_20 : i32
    %82 = arith.extui %81 : i1 to i32
    %c0_i32_21 = arith.constant 0 : i32
    %83 = arith.cmpi ne, %82, %c0_i32_21 : i32
    scf.if %83 {
      %c0_22 = arith.constant 0 : index
      %c0_23 = arith.constant 0 : index
      %84 = vector.load %arg6[%c0_22, %c0_23] : memref<1x128xf32, #tpu.memory_space<vmem>>, vector<1x128xf32>
      %85 = vector.shape_cast %84 : vector<1x128xf32> to vector<1x1x128xf32>
      %cst_24 = arith.constant dense<0.000000e+00> : vector<1xf32>
      %86 = vector.multi_reduction <add>, %85, %cst_24 [1, 2] : vector<1x1x128xf32> to vector<1xf32>
      %87 = vector.shape_cast %86 : vector<1xf32> to vector<1x1x1xf32>
      %88 = vector.extract %87[0, 0, 0] : f32 from vector<1x1x1xf32>
      %89 = vector.broadcast %88 : f32 to vector<1x1x1xf32>
      %c0_25 = arith.constant 0 : index
      %c0_26 = arith.constant 0 : index
      %c0_27 = arith.constant 0 : index
      %90 = vector.load %arg5[%c0_25, %c0_26, %c0_27] : memref<1x1x1xf32, #tpu.memory_space<vmem>>, vector<1x1x1xf32>
      tpu.vector_store %arg5[%c0_25, %c0_26, %c0_27], %89 {strides = array<i32>} : memref<1x1x1xf32, #tpu.memory_space<vmem>>, vector<1x1x1xf32>,
    } else {
    }
    return
  }
  func.func @transform_0(%arg0: i32, %arg1: i32) -> (i32, i32, i32) {
    %c1_i32 = arith.constant 1 : i32
    %0 = arith.muli %arg0, %c1_i32 : i32
    %1 = arith.addi %0, %arg1 : i32
    %c0_i32 = arith.constant 0 : i32
    %2 = arith.minsi %1, %c0_i32 : i32
    %c0_i32_0 = arith.constant 0 : i32
    %c0_i32_1 = arith.constant 0 : i32
    %c0_i32_2 = arith.constant 0 : i32
    return %c0_i32_0, %2, %c0_i32_1 : i32, i32, i32
  }
  func.func @transform_1(%arg0: i32, %arg1: i32) -> (i32, i32) {
    %c1_i32 = arith.constant 1 : i32
    %0 = arith.muli %arg0, %c1_i32 : i32
    %1 = arith.addi %0, %arg1 : i32
    %c0_i32 = arith.constant 0 : i32
    %2 = arith.minsi %1, %c0_i32 : i32
    %c0_i32_0 = arith.constant 0 : i32
    %c0_i32_1 = arith.constant 0 : i32
    return %2, %c0_i32_0 : i32, i32
  }
  func.func @transform_2(%arg0: i32, %arg1: i32) -> (i32, i32) {
    %c1_i32 = arith.constant 1 : i32
    %0 = arith.muli %arg0, %c1_i32 : i32
    %1 = arith.addi %0, %arg1 : i32
    %c0_i32 = arith.constant 0 : i32
    %2 = arith.minsi %1, %c0_i32 : i32
    %c0_i32_0 = arith.constant 0 : i32
    %c0_i32_1 = arith.constant 0 : i32
    return %2, %c0_i32_0 : i32, i32
  }
  func.func @transform_3(%arg0: i32, %arg1: i32) -> (i32, i32, i32) {
    %c0_i32 = arith.constant 0 : i32
    %c0_i32_0 = arith.constant 0 : i32
    %c0_i32_1 = arith.constant 0 : i32
    return %arg0, %c0_i32, %c0_i32_0 : i32, i32, i32
  }
}

</mosaic_0001>

<bundles_post_ra>
// kernel: tpu_custom_call.1
= control target key start
LH: loop header
LB: loop body
LE: loop exit
PB: predicated region body
PF: predicated region fallthrough
CT: control target
= control target key end

     0   :  { %8 = vsyncpa [#allocation4], 0  ;;  %s311_s0 = inlined_call_operand.hbm [shape: f32[4,1,128], index: 0, kind: input, shape index: {}]   ;;  %s312_s1 = inlined_call_operand.vmem [shape: s32[1,128], index: 1, kind: input, shape index: {}]   ;;  %s313_s2 = inlined_call_operand.vmem [shape: f32[1,128], index: 2, kind: input, shape index: {}]   ;;  %s314_s3 = inlined_call_operand.hbm [shape: f32[1,1,1], index: 3, kind: output, shape index: {}]  }
   0x1   :  { %9 = vsyncpa [#allocation5], 0  ;;  %s256_s12 = smov [#allocation3]   ;;  %s208_s16 = scalar_lea.hbm %s311_s0, 64 }
   0x2   :  { %s20_s13 = sshll.u32 %s256_s12, 4  ;;  %p209_p0 = scmp.ne.s32.totalorder %s311_s0, %s208_s16  ;;  %s21_s13 = int_to_ptr.vmem [resolvable:$true] %s20_s13 }
   0x3   :  { %p212_p1 = scmp.lt.u32.totalorder %s208_s16, %s311_s0 }
   0x5   :  { %p214_p2 = pnand %p212_p1, %p209_p0 }
   0x7   :  { %217 = shalt.err (!%p214_p2)
}
   0x8   :  { %s218_s21 = scalar_lea.vmem %s21_s13, 64  ;;  %p223_p4 = scmp.lt.s32.totalorder %s21_s13, %s21_s13 }
   0x9   :  { %p219_p3 = scmp.ne.s32.totalorder %s21_s13, %s218_s21  ;;  %p224_p5 = scmp.lt.s32.totalorder %s218_s21, %s218_s21 }
   0xb   :  { %p225_p6 = por %p224_p5, %p223_p4 }
   0xd   :  { %p226_p7 = pnand %p225_p6, %p219_p3 }
   0xf   :  { %229 = shalt.err (!%p226_p7)
}
  0x10   :  { %s257_s22 = smov 16   ;;  %s258_s23 = smov 1  }
  0x11   :  { %26 = dma.hbm_to_vmem [thread:$0]  %s311_s0, 64, %s21_s13, [#allocation4], %s257_s22, %s257_s22, %s258_s23  }
  0x12   :  { %252 = dma.done.wait [#allocation4], 64  }
  0x13   :  { %253 = vsyncadd [#allocation4], 4294967232  ;;  %v259_v0 = vmov 0.0   ;;  %v90_v1 = vld [vmem:[#allocation3] sm:$0x1]  ;;  %v138_v37 = vlaneseq  ;;  %vm152_vm5 = vcmask 1040384  }
  0x14   :  { %89 = vst [vmem:[#allocation2] sm:$0x1] %v259_v0  ;;  %v91_v2 = vld [vmem:[#allocation3 + $0x1] sm:$0x1]  ;;  %v92_v3 = vld [vmem:[#allocation3 + $0x2] sm:$0x1] }
  0x15   :  { %v96_v4 = vmax.f32 %v90_v1, %v91_v2  ;;  %v93_v5 = vld [vmem:[#allocation3 + $0x3] sm:$0x1]  ;;  %v94_v19 = vld [vmem:[%s312_s1] sm:$0x1]  ;;  %v139_v41 = vshrl.u32 %v138_v37, 7  ;;  %vm164_vm6 = vcmask 0  }
  0x16   :  { %vm103_vm0 = vcmp.eq.s32.totalorder %v94_v19, 0  ;;  %vm110_vm1 = vcmp.eq.s32.totalorder %v94_v19, 1  ;;  %vm117_vm2 = vcmp.eq.s32.totalorder %v94_v19, 2  ;;  %vm124_vm3 = vcmp.eq.s32.totalorder %v94_v19, 3  ;;  %v95_v43 = vld [vmem:[%s313_s2] sm:$0x1] }
  0x17   :  { %v97_v6 = vmax.f32 %v96_v4, %v92_v3  ;;  %v105_v26 = vsel %vm103_vm0, %v90_v1, 0.0  ;;  %vm142_vm4 = vcmp.lt.s32.totalorder %v139_v41, 1  ;;  %s260_s2 = smov [#allocation6]  }
  0x18   :  { %v112_v28 = vsel %vm110_vm1, %v91_v2, %v105_v26  ;;  %s172_s28 = sshll.u32 %s260_s2, 4  ;;  %s173_s28 = int_to_ptr.vmem [resolvable:$true] %s172_s28 }
  0x19   :  { %v98_v7 = vmax.f32 %v97_v6, %v93_v5  ;;  %v119_v31 = vsel %vm117_vm2, %v92_v3, %v112_v28  ;;  %s230_s30 = scalar_lea.vmem %s173_s28, 16  ;;  %s234_s4 = scalar_lea.vmem %s173_s28, 32 }
  0x1a   :  { %v126_v35 = vsel %vm124_vm3, %v93_v5, %v119_v31  ;;  %p231_p8 = scmp.ne.s32.totalorder %s173_s28, %s230_s30  ;;  %p235_p9 = scmp.lt.s32.totalorder %s173_s28, %s173_s28 }
  0x1b   :  { %v99_v8 = vsub.f32 %v90_v1, %v98_v7  ;;  %v106_v9 = vsub.f32 %v91_v2, %v98_v7  ;;  %v113_v10 = vsub.f32 %v92_v3, %v98_v7  ;;  %v120_v11 = vsub.f32 %v93_v5, %v98_v7  ;;  %v145_v46 = vld [vmem:[#allocation2] sm:$0x1]  ;;  %p236_p10 = scmp.lt.s32.totalorder %s234_s4, %s230_s30 }
  0x1d   :  { %v100_v12 = vmul.f32 1.442695, %v99_v8  ;;  %v107_v13 = vmul.f32 1.442695, %v106_v9  ;;  %v114_v14 = vmul.f32 1.442695, %v113_v10  ;;  %p237_p11 = por %p236_p10, %p235_p9 }
  0x1e   :  { %v121_v15 = vmul.f32 1.442695, %v120_v11 }
  0x1f   :  { %196 = vpow2.f32 %v100_v12  ;;  %p238_p12 = pnand %p237_p11, %p231_p8 }
  0x20   :  { %198 = vpow2.f32 %v107_v13 }
  0x21   :  { %200 = vpow2.f32 %v114_v14 }
  0x22   :  { %202 = vpow2.f32 %v121_v15 }
  0x29   :  { %v197_v16 = vpop.eup %196 }
  0x2a   :  { %v199_v17 = vpop.eup %198  ;;  %v104_v24 = vsel %vm103_vm0, %v197_v16, 0.0 }
  0x2b   :  { %v201_v18 = vpop.eup %200  ;;  %v109_v20 = vadd.f32 %v199_v17, %v197_v16  ;;  %v111_v25 = vsel %vm110_vm1, %v199_v17, %v104_v24 }
  0x2c   :  { %v203_v21 = vpop.eup %202  ;;  %v118_v27 = vsel %vm117_vm2, %v201_v18, %v111_v25 }
  0x2d   :  { %v116_v22 = vadd.f32 %v201_v18, %v109_v20  ;;  %v125_v29 = vsel %vm124_vm3, %v203_v21, %v118_v27 }
  0x2f   :  { %v123_v23 = vadd.f32 %v203_v21, %v116_v22 }
  0x31   :  { %204 = vlog2.f32 %v123_v23 }
  0x32   :  { %206 = vrcp.f32 %v123_v23 }
  0x3b   :  { %v205_v30 = vpop.eup %204 }
  0x3c   :  { %v207_v32 = vpop.eup %206  ;;  %v128_v33 = vmul.f32 0.6931472, %v205_v30 }
  0x3d   :  { %v132_v34 = vmul.f32 %v207_v32, %v125_v29 }
  0x3e   :  { %v129_v36 = vadd.f32 %v128_v33, %v98_v7 }
  0x3f   :  { %v133_v38 = vsub.f32 1.0, %v132_v34 }
  0x40   :  { %v130_v39 = vsub.f32 %v126_v35, %v129_v36 }
  0x41   :  { %v134_v40 = vmul.f32 %v133_v38, %v133_v38 }
  0x43   :  { %v135_v42 = vsub.f32 0.0, %v134_v40 }
  0x45   :  { %v136_v44 = vmul.f32 %v135_v42, %v130_v39 }
  0x47   :  { %v143_v45 = vmul.f32 %v136_v44, %v95_v43 }
  0x49   :  { %v144_v47 = vsel %vm142_vm4, %v143_v45, 0.0 }
  0x4a   :  { %v146_v48 = vadd.f32 %v145_v46, %v144_v47 }
  0x4c   :  { %147 = vst [vmem:[#allocation2] sm:$0x1] %v146_v48 }
  0x53   :  { %v151_v49 = vld [vmem:[#allocation2] sm:$0x1] }
  0x54   :  { %v153_v50 = vsel %vm152_vm5, %v151_v49, 0.0 }
  0x55   :  { %154 = vadd.xlane.f32.xlu0 %v153_v50 }
  0xe2   :  { %v155_v51 = vpop.xlane.xlu0 %154 }
  0xe3   :  { %v156_v52 = vrot.slane %v155_v51, 4 }
  0xe5   :  { %v157_v53 = vadd.f32 %v156_v52, %v155_v51 }
  0xe7   :  { %v158_v54 = vrot.slane %v157_v53, 2 }
  0xe9   :  { %v159_v55 = vadd.f32 %v158_v54, %v157_v53 }
  0xeb   :  { %v160_v56 = vrot.slane %v159_v55, 1 }
  0xed   :  { %v161_v57 = vadd.f32 %v160_v56, %v159_v55 }
  0xef   :  { %189 = vpush %v161_v57 }
 0x120   :  { %s190_s29 = spop %189 }
 0x121   :  { %v163_v58 = vstv %s190_s29 }
 0x122   :  { %165 = vst.msk [vmem:[#allocation6] sm:$0x1] %vm164_vm6, %v163_v58 }
 0x123   :  { %241 = shalt.err (!%p238_p12)
}
 0x124   :  { %s242_s7 = scalar_lea.hbm %s314_s3, 16 }
 0x125   :  { %p243_p13 = scmp.ne.s32.totalorder %s314_s3, %s242_s7  ;;  %p246_p0 = scmp.lt.u32.totalorder %s242_s7, %s314_s3 }
 0x127   :  { %p248_p1 = pnand %p246_p0, %p243_p13 }
 0x129   :  { %251 = shalt.err (!%p248_p1)
}
 0x12a   :  { %175 = dma.vmem_to_hbm [thread:$0]  %s173_s28, 16, %s314_s3, [#allocation5]  }
 0x12b   :  { %254 = dma.done.wait [#allocation5], 16  }
 0x12c   :  { %255 = vsyncadd [#allocation5], 4294967280 }
 0x12d   :  { %179 = vsyncpa [#allocation4], 1 }
 0x12e   :  { %180 = vsyncpa [#allocation5], 1 }

</bundles_post_ra>
